<compile_context>
chip_gen: v5e
topology: v5e:2x2
jax: 0.10.0
libtpu: 0.0.40
codegen_flags: <defaults>
</compile_context>

<pallas_src>
import math

import jax
import jax.numpy as jnp
from jax import lax
from jax.experimental import pallas as pl
from jax.experimental.pallas import tpu as pltpu  # noqa: F401  (no grid/pipeline needed)

# ---- static model config (consistent with the module) ----
N_BATCH = 2
T_SEQ = 8
D_MODEL = 32
N_HEADS = 4
D_K = 8
HDK = N_HEADS * D_K          # 32
NT = N_BATCH * T_SEQ         # 16
CAUSAL = True
DEC_SIZE = 5

# Python float ONLY (a module-level jnp scalar captured by the kernel was the
# cause of the previous tracing failure). Used host-side when building the bias.
NEG_INF = -1.0e30


# --------------------------------------------------------------------------- #
# Kernel
# --------------------------------------------------------------------------- #
def mha_kernel(xblk_ref, proj_ref, bias_ref, fc_ref, o_ref):
    """Entire forward in one invocation (no grid).

    xblk_ref : (2H*NT, 2H*D) = (128, 256)  kron(eye(2H), x_flat) block-diag input
    proj_ref : (2H*D + 2H*NT, D_K) = (384, 8)
               rows [:2H*D]  = head-stacked [Wq ; Wk/sqrt(d_k)]
               rows [2H*D:]  = head-stacked, row-broadcast [bq ; bk/sqrt(d_k)]
    bias_ref : (H*NT, H*NT) = (64, 64) additive mask, block-diagonal over
               head x batch with causal + attention_mask folded in (0 / -1e30)
    fc_ref   : (HDK + NT, D) = (48, 32): rows [:HDK] = wfc, rows [HDK:] = bfc (broadcast)
    o_ref    : (NT, D) = (16, 32)
    """
    # One matmul yields Q and K for all heads, already head-stacked along sublanes:
    #   rows [h*NT:(h+1)*NT]       -> Q_h  (also V_h: reference bug v = query(x))
    #   rows [(H+h)*NT:(H+h+1)*NT] -> K_h, pre-scaled by 1/sqrt(d_k) host-side
    qk_hs = jnp.dot(xblk_ref[...], proj_ref[:2 * N_HEADS * D_MODEL, :],
                    preferred_element_type=jnp.float32)
    qk_hs = qk_hs + proj_ref[2 * N_HEADS * D_MODEL:, :]          # (128, 8)
    q_hs = qk_hs[:N_HEADS * NT, :]                               # (64, 8) == V
    k_hs = qk_hs[N_HEADS * NT:, :]                               # (64, 8), pre-scaled

    # Single score matmul for all heads & batches; contract d_k of both operands
    # directly so no transposed copy of k is materialized.
    s = lax.dot_general(q_hs, k_hs,
                        dimension_numbers=(((1,), (1,)), ((), ())),
                        preferred_element_type=jnp.float32)      # (64, 64)
    s = s + bias_ref[...]

    # One softmax chain over 64 lanes; masked columns (-1e30 bias) underflow to 0.
    m = jnp.max(s, axis=-1, keepdims=True)
    e = jnp.exp(s - m)
    p = e / jnp.sum(e, axis=-1, keepdims=True)                   # exact divide

    # P @ V with V == Q (reproduced reference bug).
    a_hs = jnp.dot(p, q_hs, preferred_element_type=jnp.float32)  # (64, 8)

    # Output projection accumulated per head: sublane-aligned slices only,
    # no lane-axis concatenate. bfc arrives pre-broadcast to (NT, D).
    out = fc_ref[HDK:, :]                                        # (16, 32) = bfc
    for h in range(N_HEADS):                                     # static unroll
        out = out + jnp.dot(a_hs[h * NT:(h + 1) * NT, :],
                            fc_ref[h * D_K:(h + 1) * D_K, :],
                            preferred_element_type=jnp.float32)
    o_ref[...] = out


# --------------------------------------------------------------------------- #
# Host-side operand preparation (pure layout plumbing, no compute hoisting)
# --------------------------------------------------------------------------- #
def build_additive_mask(T, dec_size, causal, attention_mask, n_batch):
    """Combined attention_mask + causal mask as an additive (0 / NEG_INF) bias, (N, T, T)."""
    keep = jnp.ones((n_batch, T, T), dtype=bool)
    if attention_mask is not None:
        keep = keep & (attention_mask[:, None, :] != 0)
    if causal:
        cm = jnp.tril(jnp.ones((dec_size, dec_size), dtype=jnp.float32))
        ext = jnp.ones((T, T), dtype=jnp.float32)
        col_block = jnp.concatenate(
            [jnp.zeros((T - dec_size, dec_size), dtype=jnp.float32), cm], axis=0)
        ext = ext.at[:, T - dec_size:].set(col_block)
        keep = keep & (ext[None, :, :] != 0)
    return jnp.where(keep, 0.0, NEG_INF).astype(jnp.float32)


def build_bias_hs(T, dec_size, causal, attention_mask, n_batch, n_heads):
    """(H*NT, H*NT) additive bias: block-diagonal over head x batch, off-blocks = NEG_INF."""
    per_batch = build_additive_mask(T, dec_size, causal, attention_mask, n_batch)
    nt = n_batch * T
    big = jnp.full((n_heads * nt, n_heads * nt), NEG_INF, dtype=jnp.float32)
    for h in range(n_heads):
        for b in range(n_batch):
            r0 = h * nt + b * T
            big = big.at[r0:r0 + T, r0:r0 + T].set(per_batch[b])
    return big


def _head_stack(w, d_model, n_heads, d_k):
    """(D, H*dk) -> (H*D, dk): rows [h*D + d] = w[d, h*dk:(h+1)*dk]."""
    return w.reshape(d_model, n_heads, d_k).transpose(1, 0, 2).reshape(n_heads * d_model, d_k)


def multi_head_attention(x, params, dec_size, attention_mask=None, causal=CAUSAL):
    N, T, D = x.shape
    nt = N * T
    scale = 1.0 / math.sqrt(D_K)
    x_flat = x.reshape(nt, D)

    # Block-diagonal replication of x: diagonal block i feeds head i of Q (i < H)
    # or head i-H of K (i >= H).  One matmul then yields head-stacked Q|K.
    x_block = jnp.kron(jnp.eye(2 * N_HEADS, dtype=x_flat.dtype), x_flat)   # (128, 256)

    # Fused, head-stacked [Wq ; Wk/sqrt(d_k)] + matching row-broadcast biases.
    wq_stack = _head_stack(params["wq"], D, N_HEADS, D_K)                  # (128, 8)
    wk_stack = _head_stack(params["wk"] * scale, D, N_HEADS, D_K)          # (128, 8)
    w_all = jnp.concatenate([wq_stack, wk_stack], axis=0)                  # (256, 8)
    b_all = jnp.concatenate([params["bq"], params["bk"] * scale]).reshape(2 * N_HEADS, D_K)
    b_hs = jnp.repeat(b_all, nt, axis=0)                                   # (128, 8)
    proj_slab = jnp.concatenate([w_all, b_hs], axis=0)                     # (384, 8)

    # Head x batch block-diagonal additive mask.
    bias_hs = build_bias_hs(T, dec_size, causal, attention_mask, N, N_HEADS)  # (64, 64)

    # Output projection slab: wfc on top, bfc pre-broadcast to (NT, D) below.
    fc_slab = jnp.concatenate(
        [params["wfc"],
         jnp.broadcast_to(params["bfc"].reshape(1, D), (nt, D))], axis=0)  # (48, 32)

    # Single invocation: no grid, no pipeline scaffolding, whole arrays in VMEM.
    out_flat = pl.pallas_call(
        mha_kernel,
        out_shape=jax.ShapeDtypeStruct((nt, D), jnp.float32),
    )(x_block, proj_slab, bias_hs, fc_slab)
    # TODO(synk): if N*T grows large, add a "parallel" row-tile grid axis so the two
    # v7x TensorCores each take half the rows; at NT=16 single-shot has lower overhead.
    return out_flat.reshape(N, T, D)


# --------------------------------------------------------------------------- #
# Params + pure-JAX reference (mirrors the PyTorch forward, incl. v = query(x))
# --------------------------------------------------------------------------- #
def init_params(key, d_model, n_heads, d_k):
    """Deterministic init mimicking torch.nn.Linear (uniform +/- 1/sqrt(fan_in)).
    Weights stored as (in, out): forward is x @ W + b."""
    hdk = n_heads * d_k
    ks = jax.random.split(key, 10)

    def lin(kw, kb, fan_in, fan_out):
        bound = 1.0 / math.sqrt(fan_in)
        w = jax.random.uniform(kw, (fan_in, fan_out), jnp.float32, -bound, bound)
        b = jax.random.uniform(kb, (fan_out,), jnp.float32, -bound, bound)
        return w, b

    wq, bq = lin(ks[0], ks[1], d_model, hdk)
    wk, bk = lin(ks[2], ks[3], d_model, hdk)
    wv, bv = lin(ks[4], ks[5], d_model, hdk)   # created (as in __init__) but unused in forward
    wfc, bfc = lin(ks[6], ks[7], hdk, d_model)
    return {"wq": wq, "bq": bq, "wk": wk, "bk": bk, "wv": wv, "bv": bv,
            "wfc": wfc, "bfc": bfc}


def reference_forward(x, params, dec_size, attention_mask=None, causal=CAUSAL):
    N, T, D = x.shape
    with jax.default_matmul_precision("float32"):
        q = x @ params["wq"] + params["bq"]
        k = x @ params["wk"] + params["bk"]
        v = q                                   # reference bug: v = query(x)

        def split(t):  # (N,T,HDK) -> (N,H,T,dk)
            return t.reshape(N, T, N_HEADS, D_K).transpose(0, 2, 1, 3)

        qh, kh, vh = split(q), split(k), split(v)
        s = jnp.einsum("nhqd,nhkd->nhqk", qh, kh) / math.sqrt(D_K)
        bias = build_additive_mask(T, dec_size, causal, attention_mask, N)
        s = s + bias[:, None, :, :]
        p = jax.nn.softmax(s, axis=-1)
        a = jnp.einsum("nhqk,nhkd->nhqd", p, vh)
        a = a.transpose(0, 2, 1, 3).reshape(N, T, HDK)
        return a @ params["wfc"] + params["bfc"]


if __name__ == "__main__":
    key = jax.random.PRNGKey(0)
    kx, kp = jax.random.split(key)
    x = jax.random.normal(kx, (N_BATCH, T_SEQ, D_MODEL), dtype=jnp.float32)
    params = init_params(kp, D_MODEL, N_HEADS, D_K)

    # attention_mask: (N, T), 1 = keep, 0 = masked; mask the last token of batch 1.
    attention_mask = jnp.ones((N_BATCH, T_SEQ), dtype=jnp.float32).at[1, -1].set(0.0)

    out = multi_head_attention(x, params, DEC_SIZE, attention_mask, causal=CAUSAL)
    out = jax.block_until_ready(out)

    ref = reference_forward(x, params, DEC_SIZE, attention_mask, causal=CAUSAL)
    assert out.shape == (N_BATCH, T_SEQ, D_MODEL)
    assert jnp.allclose(out, ref, rtol=2e-3, atol=2e-3), "mismatch vs JAX reference"
    print("KERNEL_OK")
</pallas_src>

<mosaic_0001>
module attributes {stable_mosaic.version = 11 : i64} {
  func.func @mha_kernel(%arg0: memref<128x256xf32, #tpu.memory_space<vmem>>, %arg1: memref<384x8xf32, #tpu.memory_space<vmem>>, %arg2: memref<64x64xf32, #tpu.memory_space<vmem>>, %arg3: memref<48x32xf32, #tpu.memory_space<vmem>>, %arg4: memref<16x32xf32, #tpu.memory_space<vmem>>) attributes {dimension_semantics = [], scalar_prefetch = 0 : i64, scratch_operands = 0 : i64, tpu.core_type = #tpu.core_type<tc>} {
    %c0 = arith.constant 0 : index
    %c0_0 = arith.constant 0 : index
    %0 = vector.load %arg0[%c0, %c0_0] : memref<128x256xf32, #tpu.memory_space<vmem>>, vector<128x256xf32>
    %c0_1 = arith.constant 0 : index
    %c0_2 = arith.constant 0 : index
    %1 = vector.load %arg1[%c0_1, %c0_2] : memref<384x8xf32, #tpu.memory_space<vmem>>, vector<256x8xf32>
    %cst = arith.constant dense<0.000000e+00> : vector<128x8xf32>
    %2 = tpu.matmul %0, %1, %cst {dimension_numbers = #tpu.dot_dimension_numbers<[1], [0], [0], [1], [0, 0, 1, 1], [], []>} : vector<128x256xf32>, vector<256x8xf32>, vector<128x8xf32> -> vector<128x8xf32>
    %c256 = arith.constant 256 : index
    %c0_3 = arith.constant 0 : index
    %3 = vector.load %arg1[%c256, %c0_3] : memref<384x8xf32, #tpu.memory_space<vmem>>, vector<128x8xf32>
    %4 = arith.addf %2, %3 : vector<128x8xf32>
    %5 = vector.extract_strided_slice %4 {offsets = [0, 0], sizes = [64, 8], strides = [1, 1]} : vector<128x8xf32> to vector<64x8xf32>
    %6 = vector.extract_strided_slice %4 {offsets = [64, 0], sizes = [64, 8], strides = [1, 1]} : vector<128x8xf32> to vector<64x8xf32>
    %cst_4 = arith.constant dense<0.000000e+00> : vector<64x64xf32>
    %7 = tpu.matmul %5, %6, %cst_4 {dimension_numbers = #tpu.dot_dimension_numbers<[1], [1], [0], [0], [0, 0, 1, 0], [], []>} : vector<64x8xf32>, vector<64x8xf32>, vector<64x64xf32> -> vector<64x64xf32>
    %c0_5 = arith.constant 0 : index
    %c0_6 = arith.constant 0 : index
    %8 = vector.load %arg2[%c0_5, %c0_6] : memref<64x64xf32, #tpu.memory_space<vmem>>, vector<64x64xf32>
    %9 = arith.addf %7, %8 : vector<64x64xf32>
    %cst_7 = arith.constant dense<0xFF800000> : vector<64xf32>
    %10 = vector.multi_reduction <maximumf>, %9, %cst_7 [1] : vector<64x64xf32> to vector<64xf32>
    %11 = vector.shape_cast %10 : vector<64xf32> to vector<64x1xf32>
    %12 = vector.broadcast %11 : vector<64x1xf32> to vector<64x64xf32>
    %13 = arith.subf %9, %12 : vector<64x64xf32>
    %14 = math.exp %13 : vector<64x64xf32>
    %cst_8 = arith.constant dense<0.000000e+00> : vector<64xf32>
    %15 = vector.multi_reduction <add>, %14, %cst_8 [1] : vector<64x64xf32> to vector<64xf32>
    %16 = vector.shape_cast %15 : vector<64xf32> to vector<64x1xf32>
    %17 = vector.broadcast %16 : vector<64x1xf32> to vector<64x64xf32>
    %18 = arith.divf %14, %17 : vector<64x64xf32>
    %cst_9 = arith.constant dense<0.000000e+00> : vector<64x8xf32>
    %19 = tpu.matmul %18, %5, %cst_9 {dimension_numbers = #tpu.dot_dimension_numbers<[1], [0], [0], [1], [0, 0, 1, 1], [], []>} : vector<64x64xf32>, vector<64x8xf32>, vector<64x8xf32> -> vector<64x8xf32>
    %c32 = arith.constant 32 : index
    %c0_10 = arith.constant 0 : index
    %20 = vector.load %arg3[%c32, %c0_10] : memref<48x32xf32, #tpu.memory_space<vmem>>, vector<16x32xf32>
    %21 = vector.extract_strided_slice %19 {offsets = [0, 0], sizes = [16, 8], strides = [1, 1]} : vector<64x8xf32> to vector<16x8xf32>
    %c0_11 = arith.constant 0 : index
    %c0_12 = arith.constant 0 : index
    %22 = vector.load %arg3[%c0_11, %c0_12] : memref<48x32xf32, #tpu.memory_space<vmem>>, vector<8x32xf32>
    %cst_13 = arith.constant dense<0.000000e+00> : vector<16x32xf32>
    %23 = tpu.matmul %21, %22, %cst_13 {dimension_numbers = #tpu.dot_dimension_numbers<[1], [0], [0], [1], [0, 0, 1, 1], [], []>} : vector<16x8xf32>, vector<8x32xf32>, vector<16x32xf32> -> vector<16x32xf32>
    %24 = arith.addf %20, %23 : vector<16x32xf32>
    %25 = vector.extract_strided_slice %19 {offsets = [16, 0], sizes = [16, 8], strides = [1, 1]} : vector<64x8xf32> to vector<16x8xf32>
    %c8 = arith.constant 8 : index
    %c0_14 = arith.constant 0 : index
    %26 = vector.load %arg3[%c8, %c0_14] : memref<48x32xf32, #tpu.memory_space<vmem>>, vector<8x32xf32>
    %cst_15 = arith.constant dense<0.000000e+00> : vector<16x32xf32>
    %27 = tpu.matmul %25, %26, %cst_15 {dimension_numbers = #tpu.dot_dimension_numbers<[1], [0], [0], [1], [0, 0, 1, 1], [], []>} : vector<16x8xf32>, vector<8x32xf32>, vector<16x32xf32> -> vector<16x32xf32>
    %28 = arith.addf %24, %27 : vector<16x32xf32>
    %29 = vector.extract_strided_slice %19 {offsets = [32, 0], sizes = [16, 8], strides = [1, 1]} : vector<64x8xf32> to vector<16x8xf32>
    %c16 = arith.constant 16 : index
    %c0_16 = arith.constant 0 : index
    %30 = vector.load %arg3[%c16, %c0_16] : memref<48x32xf32, #tpu.memory_space<vmem>>, vector<8x32xf32>
    %cst_17 = arith.constant dense<0.000000e+00> : vector<16x32xf32>
    %31 = tpu.matmul %29, %30, %cst_17 {dimension_numbers = #tpu.dot_dimension_numbers<[1], [0], [0], [1], [0, 0, 1, 1], [], []>} : vector<16x8xf32>, vector<8x32xf32>, vector<16x32xf32> -> vector<16x32xf32>
    %32 = arith.addf %28, %31 : vector<16x32xf32>
    %33 = vector.extract_strided_slice %19 {offsets = [48, 0], sizes = [16, 8], strides = [1, 1]} : vector<64x8xf32> to vector<16x8xf32>
    %c24 = arith.constant 24 : index
    %c0_18 = arith.constant 0 : index
    %34 = vector.load %arg3[%c24, %c0_18] : memref<48x32xf32, #tpu.memory_space<vmem>>, vector<8x32xf32>
    %cst_19 = arith.constant dense<0.000000e+00> : vector<16x32xf32>
    %35 = tpu.matmul %33, %34, %cst_19 {dimension_numbers = #tpu.dot_dimension_numbers<[1], [0], [0], [1], [0, 0, 1, 1], [], []>} : vector<16x8xf32>, vector<8x32xf32>, vector<16x32xf32> -> vector<16x32xf32>
    %36 = arith.addf %32, %35 : vector<16x32xf32>
    %c0_20 = arith.constant 0 : index
    %c0_21 = arith.constant 0 : index
    %37 = vector.load %arg4[%c0_20, %c0_21] : memref<16x32xf32, #tpu.memory_space<vmem>>, vector<16x32xf32>
    tpu.vector_store %arg4[%c0_20, %c0_21], %36 {strides = array<i32>} : memref<16x32xf32, #tpu.memory_space<vmem>>, vector<16x32xf32>,
    return
  }
}

</mosaic_0001>

<bundles_post_ra>
// kernel: tpu_custom_call.1
= control target key start
LH: loop header
LB: loop body
LE: loop exit
PB: predicated region body
PF: predicated region fallthrough
CT: control target
= control target key end

     0   :  { %s1257_s0 = inlined_call_operand.vmem [shape: f32[128,256], index: 0, kind: input, shape index: {}]   ;;  %s1258_s1 = inlined_call_operand.vmem [shape: f32[384,8], index: 1, kind: input, shape index: {}]   ;;  %s1259_s2 = inlined_call_operand.vmem [shape: f32[64,64], index: 2, kind: input, shape index: {}]   ;;  %s1260_s3 = inlined_call_operand.vmem [shape: f32[48,32], index: 3, kind: input, shape index: {}]   ;;  %s1261_s4 = inlined_call_operand.hbm [shape: f32[16,32], index: 4, kind: output, shape index: {}]  }
   0x1   :  { %v65_v0 = vld [vmem:[%s1258_s1 + $0x78] sm:$0xff]  ;;  %v64_v2 = vld [vmem:[%s1258_s1 + $0x70] sm:$0xff]  ;;  %v63_v4 = vld [vmem:[%s1258_s1 + $0x68] sm:$0xff] }
   0x2   :  { %v81_v1 = vld [vmem:[%s1258_s1 + $0xf8] sm:$0xff]  ;;  %98 = vmatpush.msra.mxu0 %v65_v0  ;;  %v80_v3 = vld [vmem:[%s1258_s1 + $0xf0] sm:$0xff]  ;;  %v79_v5 = vld [vmem:[%s1258_s1 + $0xe8] sm:$0xff]  ;;  %767 = vmatpush.msra.mxu3 %v65_v0 }
   0x3   :  { %163 = vmatpush.msra.mxu1 %v81_v1  ;;  %v62_v6 = vld [vmem:[%s1258_s1 + $0x60] sm:$0xff]  ;;  %v61_v8 = vld [vmem:[%s1258_s1 + $0x58] sm:$0xff]  ;;  %v60_v10 = vld [vmem:[%s1258_s1 + $0x50] sm:$0xff] }
   0x4   :  { %99 = vmatpush.msra.mxu0 %v64_v2  ;;  %v78_v7 = vld [vmem:[%s1258_s1 + $0xe0] sm:$0xff]  ;;  %768 = vmatpush.msra.mxu3 %v64_v2  ;;  %v77_v9 = vld [vmem:[%s1258_s1 + $0xd8] sm:$0xff]  ;;  %v76_v11 = vld [vmem:[%s1258_s1 + $0xd0] sm:$0xff] }
   0x5   :  { %164 = vmatpush.msra.mxu1 %v80_v3  ;;  %v59_v12 = vld [vmem:[%s1258_s1 + $0x48] sm:$0xff]  ;;  %v58_v14 = vld [vmem:[%s1258_s1 + $0x40] sm:$0xff] }
   0x6   :  { %100 = vmatpush.msra.mxu0 %v63_v4  ;;  %769 = vmatpush.msra.mxu3 %v63_v4  ;;  %v75_v13 = vld [vmem:[%s1258_s1 + $0xc8] sm:$0xff]  ;;  %v74_v15 = vld [vmem:[%s1258_s1 + $0xc0] sm:$0xff] }
   0x7   :  { %165 = vmatpush.msra.mxu1 %v79_v5 }
   0x8   :  { %101 = vmatpush.msra.mxu0 %v62_v6  ;;  %770 = vmatpush.msra.mxu3 %v62_v6 }
   0x9   :  { %166 = vmatpush.msra.mxu1 %v78_v7 }
   0xa   :  { %102 = vmatpush.msra.mxu0 %v61_v8  ;;  %771 = vmatpush.msra.mxu3 %v61_v8 }
   0xb   :  { %167 = vmatpush.msra.mxu1 %v77_v9 }
   0xc   :  { %103 = vmatpush.msra.mxu0 %v60_v10  ;;  %772 = vmatpush.msra.mxu3 %v60_v10 }
   0xd   :  { %168 = vmatpush.msra.mxu1 %v76_v11 }
   0xe   :  { %9 = vsyncpa [#allocation3], 0  ;;  %104 = vmatpush.msra.mxu0 %v59_v12  ;;  %v57_v16 = vld [vmem:[%s1258_s1 + $0x38] sm:$0xff]  ;;  %773 = vmatpush.msra.mxu3 %v59_v12  ;;  %v56_v18 = vld [vmem:[%s1258_s1 + $0x30] sm:$0xff]  ;;  %vm236_vm0 = vcmask 64512   ;;  %vm326_vm1 = vcmask 523264  }
   0xf   :  { %169 = vmatpush.msra.mxu1 %v75_v13  ;;  %v73_v17 = vld [vmem:[%s1258_s1 + $0xb8] sm:$0xff]  ;;  %v72_v19 = vld [vmem:[%s1258_s1 + $0xb0] sm:$0xff]  ;;  %v55_v20 = vld [vmem:[%s1258_s1 + $0x28] sm:$0xff]  ;;  %s844_s16 = smov [#allocation2]   ;;  %s723_s19 = sshll.u32 %s1261_s4, 4  ;;  %s724_s19 = int_to_ptr.hbm [resolvable:$true] %s723_s19 }
  0x10   :  { %105 = vmatpush.msra.mxu0 %v58_v14  ;;  %774 = vmatpush.msra.mxu3 %v58_v14  ;;  %v71_v21 = vld [vmem:[%s1258_s1 + $0xa8] sm:$0xff]  ;;  %v54_v22 = vld [vmem:[%s1258_s1 + $0x20] sm:$0xff]  ;;  %v53_v24 = vld [vmem:[%s1258_s1 + $0x18] sm:$0xff]  ;;  %s846_s20 = smov 8  }
  0x11   :  { %170 = vmatpush.msra.mxu1 %v74_v15  ;;  %v70_v23 = vld [vmem:[%s1258_s1 + $0xa0] sm:$0xff]  ;;  %v69_v25 = vld [vmem:[%s1258_s1 + $0x98] sm:$0xff]  ;;  %v52_v26 = vld [vmem:[%s1258_s1 + $0x10] sm:$0xff] }
  0x12   :  { %106 = vmatpush.msra.mxu0 %v57_v16  ;;  %775 = vmatpush.msra.mxu3 %v57_v16  ;;  %v68_v27 = vld [vmem:[%s1258_s1 + $0x90] sm:$0xff]  ;;  %v51_v28 = vld [vmem:[%s1258_s1 + $0x8] sm:$0xff]  ;;  %v50_v30 = vld [vmem:[%s1258_s1] sm:$0xff] }
  0x13   :  { %171 = vmatpush.msra.mxu1 %v73_v17  ;;  %v67_v29 = vld [vmem:[%s1258_s1 + $0x88] sm:$0xff]  ;;  %v66_v31 = vld [vmem:[%s1258_s1 + $0x80] sm:$0xff]  ;;  %v20_v34 = vld [vmem:[%s1257_s0 + $0x10] sm:$0xff] }
  0x14   :  { %107 = vmatpush.msra.mxu0 %v56_v18  ;;  %776 = vmatpush.msra.mxu3 %v56_v18  ;;  %v18_v32 = vld [vmem:[%s1257_s0] sm:$0xff]  ;;  %v19_v33 = vld [vmem:[%s1257_s0 + $0x8] sm:$0xff]  ;;  %v21_v35 = vld [vmem:[%s1257_s0 + $0x18] sm:$0xff] }
  0x15   :  { %172 = vmatpush.msra.mxu1 %v72_v19  ;;  %v22_v36 = vld [vmem:[%s1257_s0 + $0x20] sm:$0xff]  ;;  %v23_v37 = vld [vmem:[%s1257_s0 + $0x28] sm:$0xff]  ;;  %v24_v38 = vld [vmem:[%s1257_s0 + $0x30] sm:$0xff] }
  0x16   :  { %108 = vmatpush.msra.mxu0 %v55_v20  ;;  %777 = vmatpush.msra.mxu3 %v55_v20  ;;  %v25_v39 = vld [vmem:[%s1257_s0 + $0x38] sm:$0xff]  ;;  %v26_v40 = vld [vmem:[%s1257_s0 + $0x40] sm:$0xff]  ;;  %v27_v41 = vld [vmem:[%s1257_s0 + $0x48] sm:$0xff] }
  0x17   :  { %173 = vmatpush.msra.mxu1 %v71_v21  ;;  %v28_v42 = vld [vmem:[%s1257_s0 + $0x50] sm:$0xff]  ;;  %v29_v43 = vld [vmem:[%s1257_s0 + $0x58] sm:$0xff]  ;;  %v30_v44 = vld [vmem:[%s1257_s0 + $0x60] sm:$0xff] }
  0x18   :  { %109 = vmatpush.msra.mxu0 %v54_v22  ;;  %778 = vmatpush.msra.mxu3 %v54_v22  ;;  %v31_v45 = vld [vmem:[%s1257_s0 + $0x68] sm:$0xff]  ;;  %v32_v46 = vld [vmem:[%s1257_s0 + $0x70] sm:$0xff]  ;;  %v33_v47 = vld [vmem:[%s1257_s0 + $0x78] sm:$0xff] }
  0x19   :  { %174 = vmatpush.msra.mxu1 %v70_v23  ;;  %v34_v48 = vld [vmem:[%s1257_s0 + $0x80] sm:$0xff]  ;;  %v35_v49 = vld [vmem:[%s1257_s0 + $0x88] sm:$0xff]  ;;  %v36_v50 = vld [vmem:[%s1257_s0 + $0x90] sm:$0xff] }
  0x1a   :  { %110 = vmatpush.msra.mxu0 %v53_v24  ;;  %779 = vmatpush.msra.mxu3 %v53_v24  ;;  %v37_v51 = vld [vmem:[%s1257_s0 + $0x98] sm:$0xff]  ;;  %v46_v52 = vld [vmem:[%s1257_s0 + $0xe0] sm:$0xff]  ;;  %v39_v54 = vld [vmem:[%s1257_s0 + $0xa8] sm:$0xff] }
  0x1b   :  { %175 = vmatpush.msra.mxu1 %v69_v25  ;;  %v38_v53 = vld [vmem:[%s1257_s0 + $0xa0] sm:$0xff]  ;;  %v48_v55 = vld [vmem:[%s1257_s0 + $0xf0] sm:$0xff]  ;;  %v41_v57 = vld [vmem:[%s1257_s0 + $0xb8] sm:$0xff] }
  0x1c   :  { %111 = vmatpush.msra.mxu0 %v52_v26  ;;  %780 = vmatpush.msra.mxu3 %v52_v26  ;;  %v40_v56 = vld [vmem:[%s1257_s0 + $0xb0] sm:$0xff]  ;;  %v42_v58 = vld [vmem:[%s1257_s0 + $0xc0] sm:$0xff]  ;;  %v43_v59 = vld [vmem:[%s1257_s0 + $0xc8] sm:$0xff] }
  0x1d   :  { %176 = vmatpush.msra.mxu1 %v68_v27  ;;  %v44_v60 = vld [vmem:[%s1257_s0 + $0xd0] sm:$0xff]  ;;  %v45_v61 = vld [vmem:[%s1257_s0 + $0xd8] sm:$0xff]  ;;  %v47_v62 = vld [vmem:[%s1257_s0 + $0xe8] sm:$0xff] }
  0x1e   :  { %112 = vmatpush.msra.mxu0 %v51_v28  ;;  %781 = vmatpush.msra.mxu3 %v51_v28  ;;  %v49_v63 = vld [vmem:[%s1257_s0 + $0xf8] sm:$0xff]  ;;  %v82_v0 = vld [vmem:[%s1258_s1 + $0x100] sm:$0xff]  ;;  %v88_v17 = vld [vmem:[%s1258_s1 + $0x130] sm:$0xff] }
  0x1f   :  { %177 = vmatpush.msra.mxu1 %v67_v29  ;;  %v89_v18 = vld [vmem:[%s1258_s1 + $0x138] sm:$0xff]  ;;  %v87_v19 = vld [vmem:[%s1258_s1 + $0x128] sm:$0xff]  ;;  %v86_v24 = vld [vmem:[%s1258_s1 + $0x120] sm:$0xff] }
  0x20   :  { %113 = vmatpush.msra.mxu0 %v50_v30  ;;  %782 = vmatpush.msra.mxu3 %v50_v30  ;;  %v85_v27 = vld [vmem:[%s1258_s1 + $0x118] sm:$0xff]  ;;  %v84_v30 = vld [vmem:[%s1258_s1 + $0x110] sm:$0xff] }
  0x21   :  { %178 = vmatpush.msra.mxu1 %v66_v31  ;;  %114 = vmatmul.f32.vlgmr.msra.gmra.mxu0 %v18_v32 }
  0x22   :  { %179 = vmatmul.f32.vlgmr.msra.gmra.mxu1 %v19_v33  ;;  %156 = vmatmul.f32.vlgmr.msra.gmra.mxu3 %v46_v52  ;;  %v83_v33 = vld [vmem:[%s1258_s1 + $0x108] sm:$0xff] }
  0x29   :  { %117 = vmatmul.f32.gmra.mxu0 %v20_v34 }
  0x2a   :  { %182 = vmatmul.f32.gmra.mxu1 %v21_v35  ;;  %159 = vmatmul.f32.gmra.mxu3 %v48_v55 }
  0x31   :  { %120 = vmatmul.f32.gmra.mxu0 %v22_v36 }
  0x32   :  { %185 = vmatmul.f32.gmra.mxu1 %v23_v37 }
  0x39   :  { %123 = vmatmul.f32.gmra.mxu0 %v24_v38 }
  0x3a   :  { %188 = vmatmul.f32.gmra.mxu1 %v25_v39 }
  0x41   :  { %126 = vmatmul.f32.gmra.mxu0 %v26_v40 }
  0x42   :  { %191 = vmatmul.f32.gmra.mxu1 %v27_v41 }
  0x49   :  { %129 = vmatmul.f32.gmra.mxu0 %v28_v42 }
  0x4a   :  { %194 = vmatmul.f32.gmra.mxu1 %v29_v43 }
  0x51   :  { %132 = vmatmul.f32.gmra.mxu0 %v30_v44 }
  0x52   :  { %197 = vmatmul.f32.gmra.mxu1 %v31_v45 }
  0x59   :  { %135 = vmatmul.f32.gmra.mxu0 %v32_v46 }
  0x5a   :  { %200 = vmatmul.f32.gmra.mxu1 %v33_v47 }
  0x61   :  { %138 = vmatmul.f32.gmra.mxu0 %v34_v48 }
  0x62   :  { %203 = vmatmul.f32.gmra.mxu1 %v35_v49 }
  0x69   :  { %141 = vmatmul.f32.gmra.mxu0 %v36_v50 }
  0x6a   :  { %206 = vmatmul.f32.gmra.mxu1 %v37_v51 }
  0x71   :  { %144 = vmatmul.f32.gmra.mxu0 %v38_v53  ;;  %v97_v53 = vld [vmem:[%s1258_s1 + $0x178] sm:$0xff] }
  0x72   :  { %209 = vmatmul.f32.gmra.mxu1 %v39_v54 }
  0x79   :  { %147 = vmatmul.f32.gmra.mxu0 %v40_v56  ;;  %v96_v56 = vld [vmem:[%s1258_s1 + $0x170] sm:$0xff] }
  0x7a   :  { %212 = vmatmul.f32.gmra.mxu1 %v41_v57 }
  0x81   :  { %150 = vmatmul.f32.gmra.mxu0 %v42_v58 }
  0x82   :  { %215 = vmatmul.f32.gmra.mxu1 %v43_v59 }
  0x89   :  { %153 = vmatmul.f32.gmra.mxu0 %v44_v60  ;;  %v95_v60 = vld [vmem:[%s1258_s1 + $0x168] sm:$0xff] }
  0x8a   :  { %218 = vmatmul.f32.gmra.mxu1 %v45_v61 }
  0x92   :  { %221 = vmatmul.f32.gmra.mxu1 %v47_v62 }
  0x9a   :  { %224 = vmatmul.f32.gmra.mxu1 %v49_v63 }
  0x9e   :  { %v115_v1 = vpop.f32.mrf.mxu0 }
  0x9f   :  { %v180_v2 = vpop.f32.mrf.mxu1  ;;  %v116_v3 = vadd.f32 %v115_v1, %v82_v0  ;;  %v94_v0 = vld [vmem:[%s1258_s1 + $0x160] sm:$0xff] }
  0xa1   :  { %v1067_v4 = vadd.f32 %v180_v2, %v116_v3  ;;  %v93_v3 = vld [vmem:[%s1258_s1 + $0x158] sm:$0xff] }
  0xa5   :  { %v157_v50 = vpop.f32.mrf.mxu3 }
  0xa6   :  { %v118_v5 = vpop.f32.mrf.mxu0  ;;  %v158_v58 = vadd.f32 %v157_v50, %v96_v56 }
  0xa7   :  { %v183_v6 = vpop.f32.mrf.mxu1  ;;  %v119_v37 = vadd.f32 %v118_v5, %v83_v33 }
  0xa9   :  { %v184_v40 = vadd.f32 %v183_v6, %v119_v37 }
  0xad   :  { %v160_v54 = vpop.f32.mrf.mxu3 }
  0xae   :  { %v121_v7 = vpop.f32.mrf.mxu0  ;;  %v161_v55 = vadd.f32 %v160_v54, %v97_v53 }
  0xaf   :  { %v186_v8 = vpop.f32.mrf.mxu1  ;;  %v122_v35 = vadd.f32 %v121_v7, %v84_v30  ;;  %v92_v7 = vld [vmem:[%s1258_s1 + $0x150] sm:$0xff] }
  0xb1   :  { %v187_v39 = vadd.f32 %v186_v8, %v122_v35 }
  0xb6   :  { %v124_v9 = vpop.f32.mrf.mxu0 }
  0xb7   :  { %v189_v10 = vpop.f32.mrf.mxu1  ;;  %v125_v31 = vadd.f32 %v124_v9, %v85_v27 }
  0xb9   :  { %v190_v38 = vadd.f32 %v189_v10, %v125_v31  ;;  %v91_v10 = vld [vmem:[%s1258_s1 + $0x148] sm:$0xff] }
  0xbe   :  { %v127_v11 = vpop.f32.mrf.mxu0 }
  0xbf   :  { %v192_v12 = vpop.f32.mrf.mxu1  ;;  %v128_v28 = vadd.f32 %v127_v11, %v86_v24  ;;  %v230_v24 = vld [vmem:[%s1259_s2 + $0x10] sm:$0xff] }
  0xc1   :  { %v1098_v36 = vadd.f32 %v192_v12, %v128_v28  ;;  %v231_v28 = vld [vmem:[%s1259_s2 + $0x18] sm:$0xff] }
  0xc6   :  { %v130_v13 = vpop.f32.mrf.mxu0 }
  0xc7   :  { %v195_v14 = vpop.f32.mrf.mxu1  ;;  %v131_v25 = vadd.f32 %v130_v13, %v87_v19  ;;  %v90_v13 = vld [vmem:[%s1258_s1 + $0x140] sm:$0xff]  ;;  %s721_s1 = sshll.u32 %s844_s16, 4  ;;  %s722_s1 = int_to_ptr.vmem [resolvable:$true] %s721_s1 }
  0xc9   :  { %v1092_v32 = vadd.f32 %v195_v14, %v131_v25 }
  0xce   :  { %v133_v15 = vpop.f32.mrf.mxu0 }
  0xcf   :  { %v198_v16 = vpop.f32.mrf.mxu1  ;;  %v134_v22 = vadd.f32 %v133_v15, %v88_v17 }
  0xd1   :  { %v1086_v29 = vadd.f32 %v198_v16, %v134_v22 }
  0xd6   :  { %v136_v20 = vpop.f32.mrf.mxu0 }
  0xd7   :  { %v201_v21 = vpop.f32.mrf.mxu1  ;;  %v137_v23 = vadd.f32 %v136_v20, %v89_v18  ;;  %v229_v20 = vld [vmem:[%s1259_s2 + $0x8] sm:$0xff] }
  0xd9   :  { %v1081_v26 = vadd.f32 %v201_v21, %v137_v23 }
  0xdb   :  { %551 = vmatpush.msrb.mxu3 %v1081_v26 }
  0xdd   :  { %552 = vmatpush.msrb.mxu3 %v1086_v29 }
  0xde   :  { %v139_v41 = vpop.f32.mrf.mxu0 }
  0xdf   :  { %v204_v34 = vpop.f32.mrf.mxu1  ;;  %553 = vmatpush.msrb.mxu3 %v1092_v32  ;;  %v140_v14 = vadd.f32 %v139_v41, %v90_v13 }
  0xe1   :  { %554 = vmatpush.msrb.mxu3 %v1098_v36  ;;  %v205_v16 = vadd.f32 %v204_v34, %v140_v14 }
  0xe3   :  { %555 = vmatpush.msrb.mxu3 %v190_v38 }
  0xe5   :  { %556 = vmatpush.msrb.mxu3 %v187_v39 }
  0xe6   :  { %v142_v44 = vpop.f32.mrf.mxu0 }
  0xe7   :  { %v207_v42 = vpop.f32.mrf.mxu1  ;;  %557 = vmatpush.msrb.mxu3 %v184_v40  ;;  %v143_v11 = vadd.f32 %v142_v44, %v91_v10  ;;  %v235_v44 = vld [vmem:[%s1259_s2 + $0x38] sm:$0xff] }
  0xe9   :  { %558 = vmatpush.msrb.mxu3 %v1067_v4  ;;  %v208_v15 = vadd.f32 %v207_v42, %v143_v11 }
  0xee   :  { %v145_v46 = vpop.f32.mrf.mxu0 }
  0xef   :  { %v210_v43 = vpop.f32.mrf.mxu1  ;;  %v146_v8 = vadd.f32 %v145_v46, %v92_v7 }
  0xf1   :  { %v211_v12 = vadd.f32 %v210_v43, %v146_v8 }
  0xf6   :  { %v148_v48 = vpop.f32.mrf.mxu0 }
  0xf7   :  { %v213_v45 = vpop.f32.mrf.mxu1  ;;  %v149_v5 = vadd.f32 %v148_v48, %v93_v3 }
  0xf9   :  { %v214_v9 = vadd.f32 %v213_v45, %v149_v5 }
  0xfe   :  { %v151_v51 = vpop.f32.mrf.mxu0 }
  0xff   :  { %v216_v47 = vpop.f32.mrf.mxu1  ;;  %v152_v1 = vadd.f32 %v151_v51, %v94_v0 }
 0x101   :  { %v217_v6 = vadd.f32 %v216_v47, %v152_v1 }
 0x106   :  { %v154_v61 = vpop.f32.mrf.mxu0 }
 0x107   :  { %v219_v49 = vpop.f32.mrf.mxu1  ;;  %v155_v62 = vadd.f32 %v154_v61, %v95_v60 }
 0x109   :  { %v220_v2 = vadd.f32 %v219_v49, %v155_v62 }
 0x10f   :  { %v222_v52 = vpop.f32.mrf.mxu1 }
 0x110   :  { %v223_v63 = vadd.f32 %v222_v52, %v158_v58 }
 0x117   :  { %v225_v57 = vpop.f32.mrf.mxu1 }
 0x118   :  { %v226_v59 = vadd.f32 %v225_v57, %v161_v55 }
 0x11a   :  { %735 = vmatpush.xpose.msk.msra.mxu2 %vm236_vm0, %v226_v59 }
 0x11e   :  { %736 = vmatpush.xpose.msk.msra.mxu2 %vm236_vm0, %v223_v63 }
 0x122   :  { %737 = vmatpush.xpose.msk.msra.mxu2 %vm236_vm0, %v220_v2 }
 0x126   :  { %738 = vmatpush.xpose.msk.msra.mxu2 %vm236_vm0, %v217_v6 }
 0x12a   :  { %739 = vmatpush.xpose.msk.msra.mxu2 %vm236_vm0, %v214_v9 }
 0x12e   :  { %740 = vmatpush.xpose.msk.msra.mxu2 %vm236_vm0, %v211_v12 }
 0x132   :  { %741 = vmatpush.xpose.msk.msra.mxu2 %vm236_vm0, %v208_v15 }
 0x136   :  { %742 = vmatpush.xpose.msk.msra.mxu2 %vm236_vm0, %v205_v16 }
 0x139   :  { %743 = vmatmul.msk.f32.vlgmr.msra.gmra.mxu2 %vm236_vm0, %v1067_v4  ;;  %v228_v4 = vld [vmem:[%s1259_s2] sm:$0xff] }
 0x141   :  { %744 = vmatmul.msk.f32.gmra.mxu2 %vm236_vm0, %v184_v40  ;;  %v234_v40 = vld [vmem:[%s1259_s2 + $0x30] sm:$0xff] }
 0x149   :  { %745 = vmatmul.msk.f32.gmra.mxu2 %vm236_vm0, %v187_v39 }
 0x151   :  { %746 = vmatmul.msk.f32.gmra.mxu2 %vm236_vm0, %v190_v38 }
 0x159   :  { %747 = vmatmul.msk.f32.gmra.mxu2 %vm236_vm0, %v1098_v36  ;;  %v233_v36 = vld [vmem:[%s1259_s2 + $0x28] sm:$0xff] }
 0x161   :  { %748 = vmatmul.msk.f32.gmra.mxu2 %vm236_vm0, %v1092_v32  ;;  %v232_v32 = vld [vmem:[%s1259_s2 + $0x20] sm:$0xff] }
 0x169   :  { %749 = vmatmul.msk.f32.gmra.mxu2 %vm236_vm0, %v1086_v29 }
 0x171   :  { %750 = vmatmul.msk.f32.gmra.mxu2 %vm236_vm0, %v1081_v26 }
 0x1bc   :  { %v302_v17 = vpop.f32.mrf.mxu2 }
 0x1bd   :  { %v303_v18 = vadd.f32 %v302_v17, %v228_v4 }
 0x1bf   :  { %v327_v19 = vsel %vm326_vm1, %v303_v18, -inf }
 0x1c0   :  { %328 = vmax.xlane.f32.xlu0 %v327_v19 }
 0x1c4   :  { %v305_v21 = vpop.f32.mrf.mxu2 }
 0x1c5   :  { %v306_v22 = vadd.f32 %v305_v21, %v229_v20 }
 0x1c7   :  { %v330_v23 = vsel %vm326_vm1, %v306_v22, -inf }
 0x1c8   :  { %331 = vmax.xlane.f32.xlu0 %v330_v23 }
 0x1cc   :  { %v308_v25 = vpop.f32.mrf.mxu2 }
 0x1cd   :  { %v309_v26 = vadd.f32 %v308_v25, %v230_v24 }
 0x1cf   :  { %v333_v27 = vsel %vm326_vm1, %v309_v26, -inf }
 0x1d0   :  { %334 = vmax.xlane.f32.xlu1 %v333_v27 }
 0x1d4   :  { %v311_v29 = vpop.f32.mrf.mxu2 }
 0x1d5   :  { %v312_v30 = vadd.f32 %v311_v29, %v231_v28 }
 0x1d7   :  { %v336_v31 = vsel %vm326_vm1, %v312_v30, -inf }
 0x1d8   :  { %337 = vmax.xlane.f32.xlu1 %v336_v31 }
 0x1dc   :  { %v314_v33 = vpop.f32.mrf.mxu2 }
 0x1dd   :  { %v315_v34 = vadd.f32 %v314_v33, %v232_v32 }
 0x1df   :  { %v339_v35 = vsel %vm326_vm1, %v315_v34, -inf }
 0x1e0   :  { %340 = vmax.xlane.f32.xlu2 %v339_v35 }
 0x1e4   :  { %v317_v37 = vpop.f32.mrf.mxu2 }
 0x1e5   :  { %v318_v38 = vadd.f32 %v317_v37, %v233_v36 }
 0x1e7   :  { %v342_v39 = vsel %vm326_vm1, %v318_v38, -inf }
 0x1e8   :  { %343 = vmax.xlane.f32.xlu2 %v342_v39 }
 0x1ec   :  { %v320_v41 = vpop.f32.mrf.mxu2 }
 0x1ed   :  { %v321_v42 = vadd.f32 %v320_v41, %v234_v40 }
 0x1ef   :  { %v345_v43 = vsel %vm326_vm1, %v321_v42, -inf }
 0x1f0   :  { %346 = vmax.xlane.f32.xlu0 %v345_v43 }
 0x1f4   :  { %v323_v45 = vpop.f32.mrf.mxu2 }
 0x1f5   :  { %v324_v46 = vadd.f32 %v323_v45, %v235_v44 }
 0x1f7   :  { %v348_v47 = vsel %vm326_vm1, %v324_v46, -inf }
 0x1f8   :  { %349 = vmax.xlane.f32.xlu2 %v348_v47 }
 0x233   :  { %v329_v48 = vpop.xlane.xlu0 %328 }
 0x234   :  { %v351_v49 = vsub.f32 %v303_v18, %v329_v48 }
 0x236   :  { %v359_v50 = vmul.f32 1.442695, %v351_v49 }
 0x238   :  { %786 = vpow2.f32 %v359_v50 }
 0x23b   :  { %v332_v51 = vpop.xlane.xlu0 %331 }
 0x23c   :  { %v352_v52 = vsub.f32 %v306_v22, %v332_v51 }
 0x23e   :  { %v1180_v53 = vpop.eup %786  ;;  %v361_v54 = vmul.f32 1.442695, %v352_v52 }
 0x23f   :  { %v375_v55 = vsel %vm326_vm1, %v1180_v53, 0.0 }
 0x240   :  { %788 = vpow2.f32 %v361_v54  ;;  %376 = vadd.xlane.f32.xlu1 %v375_v55 }
 0x243   :  { %v335_v56 = vpop.xlane.xlu1 %334 }
 0x244   :  { %v353_v57 = vsub.f32 %v309_v26, %v335_v56 }
 0x246   :  { %v1184_v58 = vpop.eup %788  ;;  %v363_v59 = vmul.f32 1.442695, %v353_v57 }
 0x247   :  { %v378_v60 = vsel %vm326_vm1, %v1184_v58, 0.0 }
 0x248   :  { %790 = vpow2.f32 %v363_v59  ;;  %379 = vadd.xlane.f32.xlu0 %v378_v60 }
 0x24b   :  { %v338_v61 = vpop.xlane.xlu1 %337 }
 0x24c   :  { %v354_v62 = vsub.f32 %v312_v30, %v338_v61 }
 0x24e   :  { %v1188_v63 = vpop.eup %790  ;;  %v365_v0 = vmul.f32 1.442695, %v354_v62 }
 0x24f   :  { %v381_v1 = vsel %vm326_vm1, %v1188_v63, 0.0 }
 0x250   :  { %792 = vpow2.f32 %v365_v0  ;;  %382 = vadd.xlane.f32.xlu1 %v381_v1 }
 0x253   :  { %v341_v2 = vpop.xlane.xlu2 %340 }
 0x254   :  { %v355_v3 = vsub.f32 %v315_v34, %v341_v2 }
 0x256   :  { %v1192_v5 = vpop.eup %792  ;;  %v367_v6 = vmul.f32 1.442695, %v355_v3 }
 0x257   :  { %v384_v7 = vsel %vm326_vm1, %v1192_v5, 0.0 }
 0x258   :  { %794 = vpow2.f32 %v367_v6  ;;  %385 = vadd.xlane.f32.xlu2 %v384_v7 }
 0x25b   :  { %v344_v8 = vpop.xlane.xlu2 %343 }
 0x25c   :  { %v356_v9 = vsub.f32 %v318_v38, %v344_v8 }
 0x25e   :  { %v1196_v10 = vpop.eup %794  ;;  %v369_v11 = vmul.f32 1.442695, %v356_v9 }
 0x25f   :  { %v387_v12 = vsel %vm326_vm1, %v1196_v10, 0.0 }
 0x260   :  { %796 = vpow2.f32 %v369_v11  ;;  %388 = vadd.xlane.f32.xlu0 %v387_v12 }
 0x263   :  { %v347_v13 = vpop.xlane.xlu0 %346 }
 0x264   :  { %v357_v14 = vsub.f32 %v321_v42, %v347_v13 }
 0x266   :  { %v1200_v15 = vpop.eup %796  ;;  %v371_v16 = vmul.f32 1.442695, %v357_v14 }
 0x267   :  { %v390_v4 = vsel %vm326_vm1, %v1200_v15, 0.0 }
 0x268   :  { %798 = vpow2.f32 %v371_v16  ;;  %391 = vadd.xlane.f32.xlu1 %v390_v4 }
 0x26b   :  { %v350_v17 = vpop.xlane.xlu2 %349 }
 0x26c   :  { %v358_v18 = vsub.f32 %v324_v46, %v350_v17 }
 0x26e   :  { %v1204_v19 = vpop.eup %798  ;;  %v373_v20 = vmul.f32 1.442695, %v358_v18 }
 0x26f   :  { %v393_v21 = vsel %vm326_vm1, %v1204_v19, 0.0 }
 0x270   :  { %800 = vpow2.f32 %v373_v20  ;;  %394 = vadd.xlane.f32.xlu2 %v393_v21  ;;  %v586_v20 = vld [vmem:[%s1260_s3] sm:$0xff]  ;;  %v618_v21 = vld [vmem:[%s1260_s3 + $0x8] sm:$0xff] }
 0x271   :  { %608 = vmatpush.msra.mxu3 %v586_v20  ;;  %640 = vmatpush.msrb.mxu2 %v618_v21 }
 0x276   :  { %v1208_v22 = vpop.eup %800 }
 0x277   :  { %v396_v23 = vsel %vm326_vm1, %v1208_v22, 0.0 }
 0x278   :  { %397 = vadd.xlane.f32.xlu0 %v396_v23 }
 0x2b3   :  { %v377_v24 = vpop.xlane.xlu1 %376 }
 0x2b4   :  { %802 = vrcp.f32 %v377_v24  ;;  %v410_v29 = vand.u32 2147483648, %v377_v24  ;;  %v408_v31 = vand.u32 2147483647, %v377_v24  ;;  %vm404_vm3 = vweird.f32 %v377_v24 }
 0x2b6   :  { %v411_v34 = vor.u32 1.1754944e-38, %v410_v29  ;;  %vm409_vm5 = vcmp.eq.f32.partialorder %v408_v31, 8.507059e+37 }
 0x2ba   :  { %v803_v25 = vpop.eup %802 }
 0x2bb   :  { %v400_v26 = vmul.f32 %v803_v25, %v377_v24  ;;  %v380_v27 = vpop.xlane.xlu0 %379  ;;  %vm405_vm2 = vweird.f32 %v803_v25 }
 0x2bc   :  { %804 = vrcp.f32 %v380_v27  ;;  %vm406_vm4 = vmor %vm404_vm3, %vm405_vm2  ;;  %v425_v41 = vand.u32 2147483648, %v380_v27  ;;  %v423_v43 = vand.u32 2147483647, %v380_v27  ;;  %vm419_vm7 = vweird.f32 %v380_v27 }
 0x2bd   :  { %v401_v28 = vsub.f32 1.0, %v400_v26 }
 0x2be   :  { %v426_v46 = vor.u32 1.1754944e-38, %v425_v41  ;;  %vm424_vm9 = vcmp.eq.f32.partialorder %v423_v43, 8.507059e+37 }
 0x2bf   :  { %v402_v30 = vmul.f32 %v803_v25, %v401_v28 }
 0x2c1   :  { %v403_v32 = vadd.f32 %v803_v25, %v402_v30 }
 0x2c2   :  { %v805_v33 = vpop.eup %804 }
 0x2c3   :  { %v415_v35 = vmul.f32 %v805_v33, %v380_v27  ;;  %v383_v36 = vpop.xlane.xlu1 %382  ;;  %v407_v37 = vsel %vm406_vm4, %v803_v25, %v403_v32  ;;  %vm420_vm6 = vweird.f32 %v805_v33 }
 0x2c4   :  { %806 = vrcp.f32 %v383_v36  ;;  %v412_v38 = vsel %vm409_vm5, %v411_v34, %v407_v37  ;;  %vm421_vm8 = vmor %vm419_vm7, %vm420_vm6  ;;  %v438_v55 = vand.u32 2147483647, %v383_v36  ;;  %vm434_vm11 = vweird.f32 %v383_v36 }
 0x2c5   :  { %v416_v39 = vsub.f32 1.0, %v415_v35  ;;  %v413_v40 = vmul.f32 %v1180_v53, %v412_v38  ;;  %v440_v53 = vand.u32 2147483648, %v383_v36 }
 0x2c6   :  { %vm439_vm13 = vcmp.eq.f32.partialorder %v438_v55, 8.507059e+37 }
 0x2c7   :  { %v417_v42 = vmul.f32 %v805_v33, %v416_v39  ;;  %751 = vmatmul.msk.f32.vlgmr.msrb.gmra.mxu3 %vm326_vm1, %v413_v40  ;;  %v441_v59 = vor.u32 1.1754944e-38, %v440_v53 }
 0x2c9   :  { %v418_v44 = vadd.f32 %v805_v33, %v417_v42 }
 0x2ca   :  { %v807_v45 = vpop.eup %806 }
 0x2cb   :  { %v430_v47 = vmul.f32 %v807_v45, %v383_v36  ;;  %v386_v48 = vpop.xlane.xlu2 %385  ;;  %v422_v49 = vsel %vm421_vm8, %v805_v33, %v418_v44  ;;  %vm435_vm10 = vweird.f32 %v807_v45 }
 0x2cc   :  { %808 = vrcp.f32 %v386_v48  ;;  %v427_v50 = vsel %vm424_vm9, %v426_v46, %v422_v49  ;;  %vm436_vm12 = vmor %vm434_vm11, %vm435_vm10  ;;  %v455_v3 = vand.u32 2147483648, %v386_v48  ;;  %v453_v6 = vand.u32 2147483647, %v386_v48 }
 0x2cd   :  { %v431_v51 = vsub.f32 1.0, %v430_v47  ;;  %v428_v52 = vmul.f32 %v1184_v58, %v427_v50  ;;  %vm449_vm15 = vweird.f32 %v386_v48 }
 0x2ce   :  { %v456_v9 = vor.u32 1.1754944e-38, %v455_v3  ;;  %vm454_vm3 = vcmp.eq.f32.partialorder %v453_v6, 8.507059e+37 }
 0x2cf   :  { %v432_v54 = vmul.f32 %v807_v45, %v431_v51  ;;  %752 = vmatmul.msk.f32.gmra.mxu3 %vm326_vm1, %v428_v52 }
 0x2d1   :  { %v433_v56 = vadd.f32 %v807_v45, %v432_v54 }
 0x2d2   :  { %v809_v57 = vpop.eup %808 }
 0x2d3   :  { %v445_v60 = vmul.f32 %v809_v57, %v386_v48  ;;  %v389_v61 = vpop.xlane.xlu0 %388  ;;  %v437_v62 = vsel %vm436_vm12, %v807_v45, %v433_v56  ;;  %vm450_vm14 = vweird.f32 %v809_v57 }
 0x2d4   :  { %810 = vrcp.f32 %v389_v61  ;;  %v442_v0 = vsel %vm439_vm13, %v441_v59, %v437_v62  ;;  %vm451_vm2 = vmor %vm449_vm15, %vm450_vm14  ;;  %v470_v17 = vand.u32 2147483648, %v389_v61  ;;  %v468_v18 = vand.u32 2147483647, %v389_v61  ;;  %v682_v62 = vld [vmem:[%s1260_s3 + $0x18] sm:$0xff] }
 0x2d5   :  { %v446_v1 = vsub.f32 1.0, %v445_v60  ;;  %v443_v58 = vmul.f32 %v1188_v63, %v442_v0  ;;  %vm464_vm5 = vweird.f32 %v389_v61  ;;  %704 = vmatpush.msra.mxu2 %v682_v62 }
 0x2d6   :  { %vm469_vm7 = vcmp.eq.f32.partialorder %v468_v18, 8.507059e+37 }
 0x2d7   :  { %v447_v2 = vmul.f32 %v809_v57, %v446_v1  ;;  %753 = vmatmul.msk.f32.gmra.mxu3 %vm326_vm1, %v443_v58 }
 0x2d9   :  { %v448_v7 = vadd.f32 %v809_v57, %v447_v2 }
 0x2da   :  { %v811_v8 = vpop.eup %810 }
 0x2db   :  { %v460_v11 = vmul.f32 %v811_v8, %v389_v61  ;;  %v392_v12 = vpop.xlane.xlu1 %391  ;;  %v452_v13 = vsel %vm451_vm2, %v809_v57, %v448_v7  ;;  %vm465_vm4 = vweird.f32 %v811_v8 }
 0x2dc   :  { %812 = vrcp.f32 %v392_v12  ;;  %v457_v16 = vsel %vm454_vm3, %v456_v9, %v452_v13  ;;  %vm466_vm6 = vmor %vm464_vm5, %vm465_vm4  ;;  %v485_v32 = vand.u32 2147483648, %v392_v12  ;;  %v483_v33 = vand.u32 2147483647, %v392_v12 }
 0x2dd   :  { %v461_v14 = vsub.f32 1.0, %v460_v11  ;;  %v458_v63 = vmul.f32 %v1192_v5, %v457_v16  ;;  %v471_v5 = vor.u32 1.1754944e-38, %v470_v17  ;;  %vm479_vm9 = vweird.f32 %v392_v12  ;;  %v584_v11 = vld [vmem:[%s1260_s3 + $0x20] sm:$0xff] }
 0x2de   :  { %v486_v36 = vor.u32 1.1754944e-38, %v485_v32  ;;  %vm484_vm11 = vcmp.eq.f32.partialorder %v483_v33, 8.507059e+37 }
 0x2df   :  { %v462_v4 = vmul.f32 %v811_v8, %v461_v14  ;;  %754 = vmatmul.msk.f32.gmra.mxu3 %vm326_vm1, %v458_v63 }
 0x2e1   :  { %v463_v23 = vadd.f32 %v811_v8, %v462_v4  ;;  %v585_v4 = vld [vmem:[%s1260_s3 + $0x28] sm:$0xff] }
 0x2e2   :  { %v813_v24 = vpop.eup %812 }
 0x2e3   :  { %v475_v25 = vmul.f32 %v813_v24, %v392_v12  ;;  %v395_v26 = vpop.xlane.xlu2 %394  ;;  %v467_v27 = vsel %vm466_vm6, %v811_v8, %v463_v23  ;;  %vm480_vm8 = vweird.f32 %v813_v24 }
 0x2e4   :  { %814 = vrcp.f32 %v395_v26  ;;  %v472_v29 = vsel %vm469_vm7, %v471_v5, %v467_v27  ;;  %vm481_vm10 = vmor %vm479_vm9, %vm480_vm8  ;;  %v500_v42 = vand.u32 2147483648, %v395_v26  ;;  %v498_v44 = vand.u32 2147483647, %v395_v26 }
 0x2e5   :  { %v476_v28 = vsub.f32 1.0, %v475_v25  ;;  %v473_v30 = vmul.f32 %v1196_v10, %v472_v29  ;;  %vm494_vm13 = vweird.f32 %v395_v26 }
 0x2e6   :  { %v501_v47 = vor.u32 1.1754944e-38, %v500_v42  ;;  %vm499_vm15 = vcmp.eq.f32.partialorder %v498_v44, 8.507059e+37 }
 0x2e7   :  { %v477_v31 = vmul.f32 %v813_v24, %v476_v28  ;;  %755 = vmatmul.msk.f32.gmra.mxu3 %vm326_vm1, %v473_v30 }
 0x2e9   :  { %v478_v34 = vadd.f32 %v813_v24, %v477_v31 }
 0x2ea   :  { %v815_v35 = vpop.eup %814 }
 0x2eb   :  { %v490_v37 = vmul.f32 %v815_v35, %v395_v26  ;;  %v398_v38 = vpop.xlane.xlu0 %397  ;;  %v482_v39 = vsel %vm481_vm10, %v813_v24, %v478_v34  ;;  %vm495_vm12 = vweird.f32 %v815_v35 }
 0x2ec   :  { %816 = vrcp.f32 %v398_v38  ;;  %v487_v41 = vsel %vm484_vm11, %v486_v36, %v482_v39  ;;  %vm496_vm14 = vmor %vm494_vm13, %vm495_vm12  ;;  %v515_v53 = vand.u32 2147483648, %v398_v38  ;;  %vm509_vm3 = vweird.f32 %v398_v38 }
 0x2ed   :  { %v491_v40 = vsub.f32 1.0, %v490_v37  ;;  %v488_v10 = vmul.f32 %v1200_v15, %v487_v41  ;;  %v513_v15 = vand.u32 2147483647, %v398_v38 }
 0x2ee   :  { %v516_v56 = vor.u32 1.1754944e-38, %v515_v53 }
 0x2ef   :  { %v492_v43 = vmul.f32 %v815_v35, %v491_v40  ;;  %756 = vmatmul.msk.f32.gmra.mxu3 %vm326_vm1, %v488_v10  ;;  %vm514_vm5 = vcmp.eq.f32.partialorder %v513_v15, 8.507059e+37 }
 0x2f1   :  { %v493_v45 = vadd.f32 %v815_v35, %v492_v43 }
 0x2f2   :  { %v817_v46 = vpop.eup %816 }
 0x2f3   :  { %v505_v48 = vmul.f32 %v817_v46, %v398_v38  ;;  %v497_v49 = vsel %vm496_vm14, %v815_v35, %v493_v45  ;;  %vm510_vm2 = vweird.f32 %v817_v46 }
 0x2f4   :  { %v502_v50 = vsel %vm499_vm15, %v501_v47, %v497_v49  ;;  %vm511_vm4 = vmor %vm509_vm3, %vm510_vm2 }
 0x2f5   :  { %v506_v51 = vsub.f32 1.0, %v505_v48  ;;  %v503_v52 = vmul.f32 %v1204_v19, %v502_v50  ;;  %v650_v19 = vld [vmem:[%s1260_s3 + $0x10] sm:$0xff]  ;;  %s845_s3 = smov 128  }
 0x2f6   :  { %672 = vmatpush.msrb.mxu3 %v650_v19 }
 0x2f7   :  { %v507_v54 = vmul.f32 %v817_v46, %v506_v51  ;;  %757 = vmatmul.msk.f32.gmra.mxu3 %vm326_vm1, %v503_v52 }
 0x2f9   :  { %v508_v55 = vadd.f32 %v817_v46, %v507_v54 }
 0x2fb   :  { %v512_v57 = vsel %vm511_vm4, %v817_v46, %v508_v55 }
 0x2fc   :  { %v517_v59 = vsel %vm514_vm5, %v516_v56, %v512_v57 }
 0x2fd   :  { %v518_v60 = vmul.f32 %v1208_v22, %v517_v59 }
 0x2ff   :  { %758 = vmatmul.msk.f32.gmra.mxu3 %vm326_vm1, %v518_v60  ;;  %vm714_vm1 = vcmask 261120  }
 0x34a   :  { %v560_v61 = vpop.f32.mrf.mxu3 }
 0x34b   :  { %759 = vmatmul.msk.f32.vlgmr.msra.gmra.mxu3 %vm236_vm0, %v560_v61 }
 0x352   :  { %v563_v0 = vpop.f32.mrf.mxu3 }
 0x353   :  { %760 = vmatmul.msk.f32.gmra.mxu3 %vm236_vm0, %v563_v0 }
 0x35a   :  { %v566_v1 = vpop.f32.mrf.mxu3 }
 0x35b   :  { %761 = vmatmul.msk.f32.vlgmr.msrb.gmra.mxu2 %vm236_vm0, %v566_v1 }
 0x362   :  { %v569_v22 = vpop.f32.mrf.mxu3 }
 0x363   :  { %762 = vmatmul.msk.f32.gmra.mxu2 %vm236_vm0, %v569_v22 }
 0x36a   :  { %v572_v58 = vpop.f32.mrf.mxu3 }
 0x36b   :  { %763 = vmatmul.msk.f32.vlgmr.msrb.gmra.mxu3 %vm236_vm0, %v572_v58 }
 0x372   :  { %v575_v2 = vpop.f32.mrf.mxu3 }
 0x373   :  { %764 = vmatmul.msk.f32.gmra.mxu3 %vm236_vm0, %v575_v2 }
 0x37a   :  { %v578_v3 = vpop.f32.mrf.mxu3 }
 0x37b   :  { %765 = vmatmul.msk.f32.vlgmr.msra.gmra.mxu2 %vm236_vm0, %v578_v3 }
 0x382   :  { %v581_v6 = vpop.f32.mrf.mxu3 }
 0x383   :  { %766 = vmatmul.msk.f32.gmra.mxu2 %vm236_vm0, %v581_v6 }
 0x3ce   :  { %v610_v7 = vpop.f32.mrf.mxu3 }
 0x3cf   :  { %v616_v14 = vadd.f32 %v610_v7, %v584_v11 }
 0x3d6   :  { %v613_v9 = vpop.f32.mrf.mxu3 }
 0x3d7   :  { %v617_v20 = vadd.f32 %v613_v9, %v585_v4 }
 0x3de   :  { %v642_v8 = vpop.f32.mrf.mxu2 }
 0x3df   :  { %v648_v16 = vadd.f32 %v642_v8, %v616_v14 }
 0x3e6   :  { %v645_v12 = vpop.f32.mrf.mxu2 }
 0x3e7   :  { %v649_v23 = vadd.f32 %v645_v12, %v617_v20 }
 0x3ee   :  { %v674_v13 = vpop.f32.mrf.mxu3 }
 0x3ef   :  { %v680_v63 = vadd.f32 %v674_v13, %v648_v16 }
 0x3f6   :  { %v677_v21 = vpop.f32.mrf.mxu3 }
 0x3f7   :  { %v681_v24 = vadd.f32 %v677_v21, %v649_v23 }
 0x3fe   :  { %v706_v17 = vpop.f32.mrf.mxu2 }
 0x3ff   :  { %v712_v18 = vadd.f32 %v706_v17, %v680_v63 }
 0x401   :  { %715 = vst.msk [vmem:[#allocation2] sm:$0xff] %vm714_vm1, %v712_v18 }
 0x406   :  { %v709_v5 = vpop.f32.mrf.mxu2 }
 0x407   :  { %v713_v25 = vadd.f32 %v709_v5, %v681_v24 }
 0x409   :  { %716 = vst.msk [vmem:[#allocation2 + $0x8] sm:$0xff] %vm714_vm1, %v713_v25 }
 0x40a   :  { %729 = dma.vmem_to_hbm [thread:$0]  %s722_s1, 256, %s724_s19, [#allocation3], %s845_s3, %s845_s3, %s846_s20  }
 0x40b   :  { %842 = dma.done.wait [#allocation3], 256  }
 0x40c   :  { %843 = vsyncadd [#allocation3], 4294967040 }
 0x40d   :  { %734 = vsyncpa [#allocation3], 1 }

</bundles_post_ra>
